<compile_context>
chip_gen: v7x
topology: tpu7x:2x2x1
jax: 0.10.0
libtpu: 0.0.40
codegen_flags: <defaults>
</compile_context>

<pallas_src>
import math
from itertools import product

import numpy as np
import jax
import jax.numpy as jnp
from jax.experimental import pallas as pl
from jax.experimental.pallas import tpu as pltpu


# ----------------------------------------------------------------------------
# PriorBox (parameter setup, plain numpy — identical math to the torch class)
# ----------------------------------------------------------------------------
def prior_box(cfg, image_size):
    steps = cfg["steps"]
    min_sizes_cfg = cfg["min_sizes"]
    feature_maps = [
        [math.ceil(image_size[0] / s), math.ceil(image_size[1] / s)] for s in steps
    ]
    anchors = []
    for k, f in enumerate(feature_maps):
        for i, j in product(range(f[0]), range(f[1])):
            for ms in min_sizes_cfg[k]:
                s_kx = ms / image_size[1]
                s_ky = ms / image_size[0]
                cx = (j + 0.5) * steps[k] / image_size[1]
                cy = (i + 0.5) * steps[k] / image_size[0]
                anchors.append([cx, cy, s_kx, s_ky])
    out = np.asarray(anchors, dtype=np.float32).reshape(-1, 4)
    if cfg["clip"]:
        out = np.clip(out, 0.0, 1.0)
    return out


# ----------------------------------------------------------------------------
# Fused Pallas kernel: one (level, pixel-tile) per grid step.
#   heads matmul (bf16 -> f32) + bias -> sigmoid score + prior decode.
# Internal layout: anchor-major rows on sublanes, padded pixels on lanes.
# ----------------------------------------------------------------------------
def _make_retina_kernel(anchor_num, v0, v1):
    A = anchor_num

    def kernel(lvl_ref, x_ref, w_ref, b_ref, pri_ref, boxes_ref, scores_ref):
        del lvl_ref  # only consumed by the index_maps (scalar prefetch)

        # Fused bbox+cls 1x1 conv for this pixel tile:
        # (6A, C) bf16 @ (C, tp) bf16 -> (6A, tp) f32 in one MXU pass.
        y = jnp.dot(w_ref[0], x_ref[...],
                    preferred_element_type=jnp.float32) + b_ref[0]

        box_rows, score_rows = [], []
        for a in range(A):                              # tiny static unroll
            loc = y[4 * a:4 * a + 4, :]                 # (4, tp) [tx,ty,tw,th]
            pri = pri_ref[4 * a:4 * a + 4, :]           # (4, tp) pre-scaled

            # decode (priors pre-scaled by [W,H,W,H] -> image coordinates)
            xy = pri[0:2, :] + loc[0:2, :] * (v0 * pri[2:4, :])
            wh = pri[2:4, :] * jnp.exp(loc[2:4, :] * v1)
            x1y1 = xy - 0.5 * wh
            box_rows.append(x1y1)
            box_rows.append(x1y1 + wh)

            # softmax(conf)[1] == sigmoid(conf1 - conf0): 1 exp + approx rcp
            conf = y[4 * A + 2 * a:4 * A + 2 * a + 2, :]    # (2, tp)
            d = conf[1:2, :] - conf[0:1, :]
            score_rows.append(pl.reciprocal(1.0 + jnp.exp(-d), approx=True))

        # One wide, lane-dense, unmasked store per output per tile.
        boxes_ref[...] = jnp.concatenate(box_rows, axis=0)     # (4A, tp)
        scores_ref[...] = jnp.concatenate(score_rows, axis=0)  # (A, tp)

    return kernel


# ----------------------------------------------------------------------------
# Retina forward (from SSH features onward) — one pipelined pallas_call
# ----------------------------------------------------------------------------
def retina_forward(features, params, priors_np, variance, width, height, tp=512):
    """features: list of NCHW (N=1) SSH outputs; params: list of
    (wb (A*4,C[,1,1]), bb (A*4,), wc (A*2,C[,1,1]), bc (A*2,)) per level."""
    c = int(features[0].shape[1])
    assert all(int(f.shape[0]) == 1 for f in features), "test phase uses N=1"
    p_sizes = [int(f.shape[2]) * int(f.shape[3]) for f in features]
    A = int(params[0][0].shape[0]) // 4

    # Tile size: multiple of 128, no larger than the biggest level needs.
    tp = max(128, min(int(tp), pl.cdiv(max(p_sizes), 128) * 128))
    n_tiles = [pl.cdiv(p, tp) for p in p_sizes]
    p_pads = [n * tp for n in n_tiles]
    p_total = sum(p_pads)
    n_steps = sum(n_tiles)

    # Level id of every tile (SMEM scalar prefetch -> weight/bias index_maps).
    lvl_of_tile = jnp.asarray(
        np.concatenate([np.full(n, l, np.int32) for l, n in enumerate(n_tiles)]))

    # Features: NCHW -> (C, H*W) is a free contiguous reshape (pixel = h*W+w,
    # matching PyTorch's permute(0,2,3,1) row order and PriorBox).  Pad the
    # pixel axis per level to a tile multiple, concat, cast to bf16.
    x_parts = []
    for f, p, ppad in zip(features, p_sizes, p_pads):
        x = jnp.asarray(f).reshape(c, p).astype(jnp.bfloat16)
        x_parts.append(jnp.pad(x, ((0, 0), (0, ppad - p))))
    x_cat = jnp.concatenate(x_parts, axis=1)                 # (C, p_total) bf16

    # Fuse bbox + class 1x1-conv weights/biases per level -> (A*4 + A*2, C).
    w_list, b_list = [], []
    for (wb, bb, wc, bc) in params:
        w = jnp.concatenate([jnp.asarray(wb).reshape(wb.shape[0], c),
                             jnp.asarray(wc).reshape(wc.shape[0], c)], axis=0)
        b = jnp.concatenate([jnp.asarray(bb).reshape(-1),
                             jnp.asarray(bc).reshape(-1)]).reshape(-1, 1)
        w_list.append(w.astype(jnp.bfloat16))
        b_list.append(b.astype(jnp.float32))
    w_stack = jnp.stack(w_list)                              # (n_lvl, 6A, C) bf16
    b_stack = jnp.stack(b_list)                              # (n_lvl, 6A, 1) f32

    # Priors: torch order is level-major / pixel-major / anchor-minor.
    # Rearrange to the kernel's (4A, p_total) layout (anchor-major rows,
    # component within anchor on sublanes, padded pixels on lanes), and
    # pre-scale by [W,H,W,H] so decode writes image coordinates directly
    # (exact: the decode is linear in the scale).
    scale = np.array([width, height, width, height], np.float32)
    pri_scaled = np.asarray(priors_np, np.float32) * scale
    pri_parts, off = [], 0
    for p, ppad in zip(p_sizes, p_pads):
        q = pri_scaled[off:off + p * A].reshape(p, A, 4)     # (P_l, A, 4)
        q = np.transpose(q, (1, 2, 0)).reshape(4 * A, p)     # (4A, P_l)
        pri_parts.append(np.pad(q, ((0, 0), (0, ppad - p))))
        off += p * A
    pri_cat = jnp.asarray(np.concatenate(pri_parts, axis=1))  # (4A, p_total)

    kernel = _make_retina_kernel(A, float(variance[0]), float(variance[1]))

    cost = pl.CostEstimate(
        flops=int(2 * c * 6 * A * p_total + 12 * A * p_total),
        transcendentals=int(4 * A * p_total),
        bytes_accessed=int(x_cat.size * 2 + w_stack.size * 2 + b_stack.size * 4
                           + pri_cat.size * 4 + 5 * A * p_total * 4),
    )

    boxes_int, scores_int = pl.pallas_call(
        kernel,
        grid_spec=pltpu.PrefetchScalarGridSpec(
            num_scalar_prefetch=1,
            grid=(n_steps,),
            in_specs=[
                # feature tile: (C, tp) bf16, marches along the pixel axis
                pl.BlockSpec((c, tp), lambda t, lvl: (0, t)),
                # per-level fused weights / bias stay resident per level
                pl.BlockSpec((1, 6 * A, c), lambda t, lvl: (lvl[t], 0, 0)),
                pl.BlockSpec((1, 6 * A, 1), lambda t, lvl: (lvl[t], 0, 0)),
                # pre-scaled priors for this tile
                pl.BlockSpec((4 * A, tp), lambda t, lvl: (0, t)),
            ],
            out_specs=(
                pl.BlockSpec((4 * A, tp), lambda t, lvl: (0, t)),
                pl.BlockSpec((A, tp), lambda t, lvl: (0, t)),
            ),
        ),
        out_shape=(
            jax.ShapeDtypeStruct((4 * A, p_total), jnp.float32),
            jax.ShapeDtypeStruct((A, p_total), jnp.float32),
        ),
        compiler_params=pltpu.CompilerParams(
            dimension_semantics=("parallel",)),   # megacore splits the tiles
        cost_estimate=cost,
    )(lvl_of_tile, x_cat, w_stack, b_stack, pri_cat)

    # Internal (anchor-major, padded pixels) -> PyTorch (pixel-major,
    # anchor-interleaved) order via per-level reshape/transpose (no gather).
    boxes_parts, score_parts, coff = [], [], 0
    for p, ppad in zip(p_sizes, p_pads):
        bl = boxes_int[:, coff:coff + p]                         # (4A, P_l)
        boxes_parts.append(
            bl.reshape(A, 4, p).transpose(2, 0, 1).reshape(p * A, 4))
        sl = scores_int[:, coff:coff + p]                        # (A, P_l)
        score_parts.append(sl.T.reshape(p * A))
        coff += ppad
    boxes = jnp.concatenate(boxes_parts, axis=0)                 # (num_priors, 4)
    scores = jnp.concatenate(score_parts, axis=0)                # (num_priors,)
    return boxes, scores


# ----------------------------------------------------------------------------
# Pure numpy float64 reference (mirrors the PyTorch semantics)
# ----------------------------------------------------------------------------
def reference(features, params, priors, variance, width, height):
    locs, confs = [], []
    for x, (wb, bb, wc, bc) in zip(features, params):
        x = np.asarray(x, np.float64)
        wb = np.asarray(wb, np.float64).reshape(wb.shape[0], x.shape[1])
        wc = np.asarray(wc, np.float64).reshape(wc.shape[0], x.shape[1])
        bb = np.asarray(bb, np.float64)
        bc = np.asarray(bc, np.float64)
        ob = np.einsum("nchw,oc->nohw", x, wb) + bb[None, :, None, None]
        oc = np.einsum("nchw,oc->nohw", x, wc) + bc[None, :, None, None]
        locs.append(np.transpose(ob, (0, 2, 3, 1)).reshape(x.shape[0], -1, 4))
        confs.append(np.transpose(oc, (0, 2, 3, 1)).reshape(x.shape[0], -1, 2))
    loc = np.concatenate(locs, axis=1)[0]
    conf = np.concatenate(confs, axis=1)
    e = np.exp(conf - conf.max(-1, keepdims=True))
    scores = (e / e.sum(-1, keepdims=True))[..., 1][0]
    pri = np.asarray(priors, np.float64)
    boxes = np.concatenate(
        (pri[:, :2] + loc[:, :2] * variance[0] * pri[:, 2:],
         pri[:, 2:] * np.exp(loc[:, 2:] * variance[1])), axis=1)
    boxes[:, :2] -= boxes[:, 2:] / 2
    boxes[:, 2:] += boxes[:, :2]
    scale = np.array([width, height, width, height], np.float64)
    return boxes * scale, scores


# ----------------------------------------------------------------------------
if __name__ == "__main__":
    # Small synthetic config (anchor_num = 2 per location, matching the heads)
    cfg = {
        "min_sizes": [[16, 32], [64, 128], [256, 512]],
        "steps": [8, 16, 32],
        "variance": [0.1, 0.2],
        "clip": False,
        "out_channel": 32,
    }
    width, height = 64, 64
    priors_np = prior_box(cfg, image_size=(height, width))        # (168, 4)

    C = cfg["out_channel"]
    anchor_num = 2
    fmaps = [(math.ceil(height / s), math.ceil(width / s)) for s in cfg["steps"]]

    key = jax.random.PRNGKey(0)
    # SSH output feature maps (NCHW) — stand-ins for body->fpn->ssh outputs.
    features = []
    for (fh, fw) in fmaps:
        key, k = jax.random.split(key)
        features.append(jax.random.normal(k, (1, C, fh, fw), jnp.float32))

    # Deterministic head parameters: 3 x (BboxHead 1x1 conv, ClassHead 1x1 conv)
    params = []
    for _ in range(3):
        key, k1, k2, k3, k4 = jax.random.split(key, 5)
        wb = 0.1 * jax.random.normal(k1, (anchor_num * 4, C), jnp.float32)
        bb = 0.1 * jax.random.normal(k2, (anchor_num * 4,), jnp.float32)
        wc = 0.1 * jax.random.normal(k3, (anchor_num * 2, C), jnp.float32)
        bc = 0.1 * jax.random.normal(k4, (anchor_num * 2,), jnp.float32)
        params.append((wb, bb, wc, bc))

    boxes, scores = retina_forward(
        features, params, priors_np, cfg["variance"], width, height
    )
    boxes = jax.block_until_ready(boxes)
    scores = jax.block_until_ready(scores)

    assert boxes.shape == (priors_np.shape[0], 4)
    assert scores.shape == (priors_np.shape[0],)

    # The kernel deliberately DMAs features / head weights as bf16 (the
    # HBM-bound lever from the perf review); validate against a reference fed
    # the same bf16-rounded values so the kernel math itself (f32 accumulate,
    # f32 decode, sigmoid score) is checked tightly.
    def _bf16(a):
        return np.asarray(
            jnp.asarray(a).astype(jnp.bfloat16).astype(jnp.float32), np.float64)

    features_q = [_bf16(f) for f in features]
    params_q = [(_bf16(wb), np.asarray(bb, np.float64),
                 _bf16(wc), np.asarray(bc, np.float64))
                for (wb, bb, wc, bc) in params]
    ref_boxes, ref_scores = reference(
        features_q, params_q, priors_np, cfg["variance"], width, height
    )

    np.testing.assert_allclose(np.asarray(boxes), ref_boxes, rtol=1e-3, atol=5e-3)
    np.testing.assert_allclose(np.asarray(scores), ref_scores, rtol=1e-3, atol=5e-3)

    print("KERNEL_OK")
</pallas_src>

<mosaic_0001>
module attributes {stable_mosaic.version = 11 : i64} {
  func.func @kernel(%arg0: i32, %arg1: memref<3xi32, #tpu.memory_space<smem>>, %arg2: memref<32x128xbf16, #tpu.memory_space<vmem>>, %arg3: memref<1x12x32xbf16, #tpu.memory_space<vmem>>, %arg4: memref<1x12x1xf32, #tpu.memory_space<vmem>>, %arg5: memref<8x128xf32, #tpu.memory_space<vmem>>, %arg6: memref<8x128xf32, #tpu.memory_space<vmem>>, %arg7: memref<2x128xf32, #tpu.memory_space<vmem>>) attributes {dimension_semantics = [#tpu.dimension_semantics<parallel>], iteration_bounds = array<i64: 3>, scalar_prefetch = 1 : i64, scratch_operands = 0 : i64, tpu.core_type = #tpu.core_type<tc>, window_params = [{transform_indices = @transform_0, window_bounds = array<i64: 32, 128>}, {transform_indices = @transform_1, window_bounds = array<i64: 1, 12, 32>}, {transform_indices = @transform_2, window_bounds = array<i64: 1, 12, 1>}, {transform_indices = @transform_3, window_bounds = array<i64: 8, 128>}, {transform_indices = @transform_4, window_bounds = array<i64: 8, 128>}, {transform_indices = @transform_5, window_bounds = array<i64: 2, 128>}]} {
    %c0 = arith.constant 0 : index
    %c0_0 = arith.constant 0 : index
    %c0_1 = arith.constant 0 : index
    %0 = vector.load %arg3[%c0, %c0_0, %c0_1] : memref<1x12x32xbf16, #tpu.memory_space<vmem>>, vector<1x12x32xbf16>
    %1 = vector.shape_cast %0 : vector<1x12x32xbf16> to vector<12x32xbf16>
    %c0_2 = arith.constant 0 : index
    %c0_3 = arith.constant 0 : index
    %2 = vector.load %arg2[%c0_2, %c0_3] : memref<32x128xbf16, #tpu.memory_space<vmem>>, vector<32x128xbf16>
    %cst = arith.constant dense<0.000000e+00> : vector<12x128xf32>
    %3 = tpu.matmul %1, %2, %cst {dimension_numbers = #tpu.dot_dimension_numbers<[1], [0], [0], [1], [0, 0, 1, 1], [], []>} : vector<12x32xbf16>, vector<32x128xbf16>, vector<12x128xf32> -> vector<12x128xf32>
    %c0_4 = arith.constant 0 : index
    %c0_5 = arith.constant 0 : index
    %c0_6 = arith.constant 0 : index
    %4 = vector.load %arg4[%c0_4, %c0_5, %c0_6] : memref<1x12x1xf32, #tpu.memory_space<vmem>>, vector<1x12x1xf32>
    %5 = vector.shape_cast %4 : vector<1x12x1xf32> to vector<12x1xf32>
    %6 = vector.broadcast %5 : vector<12x1xf32> to vector<12x128xf32>
    %7 = arith.addf %3, %6 : vector<12x128xf32>
    %8 = vector.extract_strided_slice %7 {offsets = [0, 0], sizes = [4, 128], strides = [1, 1]} : vector<12x128xf32> to vector<4x128xf32>
    %c0_7 = arith.constant 0 : index
    %c0_8 = arith.constant 0 : index
    %9 = vector.load %arg5[%c0_7, %c0_8] : memref<8x128xf32, #tpu.memory_space<vmem>>, vector<4x128xf32>
    %10 = vector.extract_strided_slice %9 {offsets = [0, 0], sizes = [2, 128], strides = [1, 1]} : vector<4x128xf32> to vector<2x128xf32>
    %11 = vector.extract_strided_slice %8 {offsets = [0, 0], sizes = [2, 128], strides = [1, 1]} : vector<4x128xf32> to vector<2x128xf32>
    %12 = vector.extract_strided_slice %9 {offsets = [2, 0], sizes = [2, 128], strides = [1, 1]} : vector<4x128xf32> to vector<2x128xf32>
    %cst_9 = arith.constant 1.000000e-01 : f32
    %13 = vector.broadcast %cst_9 : f32 to vector<2x128xf32>
    %14 = arith.mulf %13, %12 : vector<2x128xf32>
    %15 = arith.mulf %11, %14 : vector<2x128xf32>
    %16 = arith.addf %10, %15 : vector<2x128xf32>
    %17 = vector.extract_strided_slice %9 {offsets = [2, 0], sizes = [2, 128], strides = [1, 1]} : vector<4x128xf32> to vector<2x128xf32>
    %18 = vector.extract_strided_slice %8 {offsets = [2, 0], sizes = [2, 128], strides = [1, 1]} : vector<4x128xf32> to vector<2x128xf32>
    %cst_10 = arith.constant 2.000000e-01 : f32
    %19 = vector.broadcast %cst_10 : f32 to vector<2x128xf32>
    %20 = arith.mulf %18, %19 : vector<2x128xf32>
    %21 = math.exp %20 : vector<2x128xf32>
    %22 = arith.mulf %17, %21 : vector<2x128xf32>
    %cst_11 = arith.constant 5.000000e-01 : f32
    %23 = vector.broadcast %cst_11 : f32 to vector<2x128xf32>
    %24 = arith.mulf %23, %22 : vector<2x128xf32>
    %25 = arith.subf %16, %24 : vector<2x128xf32>
    %26 = arith.addf %25, %22 : vector<2x128xf32>
    %27 = vector.extract_strided_slice %7 {offsets = [8, 0], sizes = [2, 128], strides = [1, 1]} : vector<12x128xf32> to vector<2x128xf32>
    %28 = vector.extract_strided_slice %27 {offsets = [1, 0], sizes = [1, 128], strides = [1, 1]} : vector<2x128xf32> to vector<1x128xf32>
    %29 = vector.extract_strided_slice %27 {offsets = [0, 0], sizes = [1, 128], strides = [1, 1]} : vector<2x128xf32> to vector<1x128xf32>
    %30 = arith.subf %28, %29 : vector<1x128xf32>
    %cst_12 = arith.constant 0.000000e+00 : f32
    %31 = vector.broadcast %cst_12 : f32 to vector<1x128xf32>
    %32 = arith.subf %31, %30 : vector<1x128xf32>
    %33 = math.exp %32 : vector<1x128xf32>
    %cst_13 = arith.constant 1.000000e+00 : f32
    %34 = vector.broadcast %cst_13 : f32 to vector<1x128xf32>
    %35 = arith.addf %34, %33 : vector<1x128xf32>
    %36 = tpu.reciprocal %35 {approx = true} : vector<1x128xf32> -> vector<1x128xf32>
    %37 = vector.extract_strided_slice %7 {offsets = [4, 0], sizes = [4, 128], strides = [1, 1]} : vector<12x128xf32> to vector<4x128xf32>
    %c4 = arith.constant 4 : index
    %c0_14 = arith.constant 0 : index
    %38 = vector.load %arg5[%c4, %c0_14] : memref<8x128xf32, #tpu.memory_space<vmem>>, vector<4x128xf32>
    %39 = vector.extract_strided_slice %38 {offsets = [0, 0], sizes = [2, 128], strides = [1, 1]} : vector<4x128xf32> to vector<2x128xf32>
    %40 = vector.extract_strided_slice %37 {offsets = [0, 0], sizes = [2, 128], strides = [1, 1]} : vector<4x128xf32> to vector<2x128xf32>
    %41 = vector.extract_strided_slice %38 {offsets = [2, 0], sizes = [2, 128], strides = [1, 1]} : vector<4x128xf32> to vector<2x128xf32>
    %cst_15 = arith.constant 1.000000e-01 : f32
    %42 = vector.broadcast %cst_15 : f32 to vector<2x128xf32>
    %43 = arith.mulf %42, %41 : vector<2x128xf32>
    %44 = arith.mulf %40, %43 : vector<2x128xf32>
    %45 = arith.addf %39, %44 : vector<2x128xf32>
    %46 = vector.extract_strided_slice %38 {offsets = [2, 0], sizes = [2, 128], strides = [1, 1]} : vector<4x128xf32> to vector<2x128xf32>
    %47 = vector.extract_strided_slice %37 {offsets = [2, 0], sizes = [2, 128], strides = [1, 1]} : vector<4x128xf32> to vector<2x128xf32>
    %cst_16 = arith.constant 2.000000e-01 : f32
    %48 = vector.broadcast %cst_16 : f32 to vector<2x128xf32>
    %49 = arith.mulf %47, %48 : vector<2x128xf32>
    %50 = math.exp %49 : vector<2x128xf32>
    %51 = arith.mulf %46, %50 : vector<2x128xf32>
    %cst_17 = arith.constant 5.000000e-01 : f32
    %52 = vector.broadcast %cst_17 : f32 to vector<2x128xf32>
    %53 = arith.mulf %52, %51 : vector<2x128xf32>
    %54 = arith.subf %45, %53 : vector<2x128xf32>
    %55 = arith.addf %54, %51 : vector<2x128xf32>
    %56 = vector.extract_strided_slice %7 {offsets = [10, 0], sizes = [2, 128], strides = [1, 1]} : vector<12x128xf32> to vector<2x128xf32>
    %57 = vector.extract_strided_slice %56 {offsets = [1, 0], sizes = [1, 128], strides = [1, 1]} : vector<2x128xf32> to vector<1x128xf32>
    %58 = vector.extract_strided_slice %56 {offsets = [0, 0], sizes = [1, 128], strides = [1, 1]} : vector<2x128xf32> to vector<1x128xf32>
    %59 = arith.subf %57, %58 : vector<1x128xf32>
    %cst_18 = arith.constant 0.000000e+00 : f32
    %60 = vector.broadcast %cst_18 : f32 to vector<1x128xf32>
    %61 = arith.subf %60, %59 : vector<1x128xf32>
    %62 = math.exp %61 : vector<1x128xf32>
    %cst_19 = arith.constant 1.000000e+00 : f32
    %63 = vector.broadcast %cst_19 : f32 to vector<1x128xf32>
    %64 = arith.addf %63, %62 : vector<1x128xf32>
    %65 = tpu.reciprocal %64 {approx = true} : vector<1x128xf32> -> vector<1x128xf32>
    %66 = tpu.concatenate %25, %26, %54, %55 in 0 : vector<2x128xf32>, vector<2x128xf32>, vector<2x128xf32>, vector<2x128xf32> -> vector<8x128xf32>
    %c0_20 = arith.constant 0 : index
    %c0_21 = arith.constant 0 : index
    %67 = vector.load %arg6[%c0_20, %c0_21] : memref<8x128xf32, #tpu.memory_space<vmem>>, vector<8x128xf32>
    tpu.vector_store %arg6[%c0_20, %c0_21], %66 {strides = array<i32>} : memref<8x128xf32, #tpu.memory_space<vmem>>, vector<8x128xf32>,
    %68 = tpu.concatenate %36, %65 in 0 : vector<1x128xf32>, vector<1x128xf32> -> vector<2x128xf32>
    %c0_22 = arith.constant 0 : index
    %c0_23 = arith.constant 0 : index
    %69 = vector.load %arg7[%c0_22, %c0_23] : memref<2x128xf32, #tpu.memory_space<vmem>>, vector<2x128xf32>
    tpu.vector_store %arg7[%c0_22, %c0_23], %68 {strides = array<i32>} : memref<2x128xf32, #tpu.memory_space<vmem>>, vector<2x128xf32>,
    return
  }
  func.func @transform_0(%arg0: i32, %arg1: memref<3xi32, #tpu.memory_space<smem>>) -> (i32, i32) {
    %c0_i32 = arith.constant 0 : i32
    %c0_i32_0 = arith.constant 0 : i32
    return %c0_i32, %arg0 : i32, i32
  }
  func.func @transform_1(%arg0: i32, %arg1: memref<3xi32, #tpu.memory_space<smem>>) -> (i32, i32, i32) {
    %0 = arith.index_cast %arg0 : i32 to index
    %1 = memref.load %arg1[%0] : memref<3xi32, #tpu.memory_space<smem>>
    %c0_i32 = arith.constant 0 : i32
    %c0_i32_0 = arith.constant 0 : i32
    %c0_i32_1 = arith.constant 0 : i32
    return %1, %c0_i32, %c0_i32_0 : i32, i32, i32
  }
  func.func @transform_2(%arg0: i32, %arg1: memref<3xi32, #tpu.memory_space<smem>>) -> (i32, i32, i32) {
    %0 = arith.index_cast %arg0 : i32 to index
    %1 = memref.load %arg1[%0] : memref<3xi32, #tpu.memory_space<smem>>
    %c0_i32 = arith.constant 0 : i32
    %c0_i32_0 = arith.constant 0 : i32
    %c0_i32_1 = arith.constant 0 : i32
    return %1, %c0_i32, %c0_i32_0 : i32, i32, i32
  }
  func.func @transform_3(%arg0: i32, %arg1: memref<3xi32, #tpu.memory_space<smem>>) -> (i32, i32) {
    %c0_i32 = arith.constant 0 : i32
    %c0_i32_0 = arith.constant 0 : i32
    return %c0_i32, %arg0 : i32, i32
  }
  func.func @transform_4(%arg0: i32, %arg1: memref<3xi32, #tpu.memory_space<smem>>) -> (i32, i32) {
    %c0_i32 = arith.constant 0 : i32
    %c0_i32_0 = arith.constant 0 : i32
    return %c0_i32, %arg0 : i32, i32
  }
  func.func @transform_5(%arg0: i32, %arg1: memref<3xi32, #tpu.memory_space<smem>>) -> (i32, i32) {
    %c0_i32 = arith.constant 0 : i32
    %c0_i32_0 = arith.constant 0 : i32
    return %c0_i32, %arg0 : i32, i32
  }
}

</mosaic_0001>

<bundles_post_ra>
// kernel: tpu_custom_call.1
= control target key start
LH: loop header
LB: loop body
LE: loop exit
PB: predicated region body
PF: predicated region fallthrough
CT: control target
= control target key end

     0   :  { %s1409_s0 = inlined_call_operand.vmem [shape: s32[3], index: 0, kind: input, shape index: {}]   ;;  %s1410_s1 = inlined_call_operand.vmem [shape: bf16[32,384], index: 1, kind: input, shape index: {}]   ;;  %s1411_s2 = inlined_call_operand.hbm [shape: bf16[3,12,32], index: 2, kind: input, shape index: {}]   ;;  %s1412_s3 = inlined_call_operand.vmem [shape: f32[3,12,1], index: 3, kind: input, shape index: {}]   ;;  %s1413_s4 = inlined_call_operand.hbm [shape: f32[8,384], index: 4, kind: input, shape index: {}]   ;;  %s1414_s5 = inlined_call_operand.hbm [shape: f32[8,384], index: 5, kind: output, shape index: {0}]   ;;  %s1415_s6 = inlined_call_operand.hbm [shape: f32[2,384], index: 6, kind: output, shape index: {1}]  }
   0x1   :  { %1425 = sst [smem:[#allocation23_spill]] %s1410_s1  ;;  %s12_s23 = sshll.u32 %s1409_s0, 4  ;;  %s13_s23 = int_to_ptr.vmem [resolvable:$true] %s12_s23 }
   0x2   :  { %s877_s24 = scalar_lea.vmem %s13_s23, 16  ;;  %p882_p1 = scmp.lt.s32.totalorder %s13_s23, %s13_s23 }
   0x3   :  { %p878_p0 = scmp.ne.s32.totalorder %s13_s23, %s877_s24  ;;  %p883_p2 = scmp.lt.s32.totalorder %s877_s24, %s877_s24 }
   0x5   :  { %p884_p3 = por %p883_p2, %p882_p1 }
   0x7   :  { %p885_p4 = pnand %p884_p3, %p878_p0 }
   0x9   :  { %888 = shalt.err (!%p885_p4)  }
   0xa   :  { %s1075_s25 = smov [#allocation3]  }
   0xb   :  { %15 = dma.vmem_to_smem %s13_s23, 16, %s1075_s25, [#allocation2] }
   0xc   :  { %1029 = dma.done.wait [#allocation2], 16 }
   0xd   :  { %1030 = vsyncadd [#allocation2], 4294967280 }
   0xe   :  { %17 = sfence }
   0xf   :  { %18 = vsyncpa [#allocation6], 0 }
  0x10   :  { %20 = vsyncpa [#allocation6 + $0x1], 0 }
  0x11   :  { %21 = vsyncpa [#allocation9], 0 }
  0x12   :  { %23 = vsyncpa [#allocation9 + $0x1], 0 }
  0x13   :  { %24 = vsyncpa [#allocation7], 0 }
  0x14   :  { %26 = vsyncpa [#allocation7 + $0x1], 0 }
  0x15   :  { %27 = vsyncpa [#allocation12], 0 }
  0x16   :  { %29 = vsyncpa [#allocation12 + $0x1], 0  ;;  %s1123_s0 = smov 0   ;;  %s1125_s26 = smov 0  }
  0x17   :  { %s1127_s27 = smov 0   ;;  %s1129_s28 = smov 0  }
  0x18   :  { %s1131_s29 = smov 0   ;;  %s1133_s30 = smov 0  }
  0x19   :  { %s1135_s7 = smov 0  }
  0x1a LB: > { %s1157_s8 = sadd.s32 4294967295, %s1073_s7   ;;  %s746_s9 = sadd.s32 4294967294, %s1073_s7   ;;  %s1073_s7 = sphi %s1135_s7, %s1444_s7   ;;  %s1069_s30 = sphi %s1133_s30, %s1452_s30   ;;  %s1065_s29 = sphi %s1131_s29, %s1451_s29   ;;  %s1061_s28 = sphi %s1129_s28, %s1450_s28   ;;  %s1057_s27 = sphi %s1127_s27, %s1449_s27   ;;  %s1053_s26 = sphi %s1125_s26, %s1448_s26   ;;  %s1049_s0 = sphi %s1123_s0, %s1447_s0  }
  0x1b   : > { %s1161_s10 = sadd.s32 1, %s1073_s7   ;;  %s42_s11 = sadd.s32 1, %s1069_s30 }
  0x1c   : > { %1426 = sst [smem:[#allocation19_spill]] %s1161_s10  ;;  %s39_s12 = ssub.s32 %s1073_s7, %s1161_s10 }
  0x1d   : > { %p49_p5 = scmp.ne.s32.totalorder %s1069_s30, %s1065_s29  ;;  %p40_p6 = scmp.eq.s32.totalorder %s39_s12, 0 }
  0x1e   : > { %p50_p7 = scmp.eq.s32.totalorder %s1073_s7, 0  ;;  %s65_s13 = sld [smem:[#allocation3 + %s1073_s7]] }
  0x1f   : > { %s66_s14 = sld [smem:[#allocation3 + %s1161_s10]]  ;;  %s70_s17 = sadd.s32 1, %s1061_s28 }
  0x20   : > { %s1172_s15 = scalar_select %p40_p6, %s1069_s30, %s42_s11  }
  0x21   : > { %p1177_p8 = por %p50_p7, %p49_p5  ;;  %p77_p9 = scmp.ne.s32.totalorder %s1061_s28, %s1057_s27 }
  0x22   : > { %1427 = sst [smem:[#allocation20_spill]] %s1172_s15  ;;  %p83_p10 = scmp.ne.s32.totalorder %s1057_s27, %s1053_s26 }
  0x23   : > { %p84_p11 = scmp.eq.s32.totalorder %s1157_s8, 0  ;;  %p137_p12 = scmp.ne.s32.totalorder %s1065_s29, %s1049_s0 }
  0x24   : > { %p1188_p13 = por %p77_p9, %p50_p7  ;;  %p161_p0 = scmp.eq.s32.totalorder %s1157_s8, 2 }
  0x25   : > { %s67_s19 = ssub.s32 %s65_s13, %s66_s14  ;;  %p1193_p1 = por %p84_p11, %p83_p10 }
  0x26   : > { %s1429_s18 = scalar_select %p1188_p13, 1, 0 }
  0x27   : > { %s1430_s20 = scalar_select %p1193_p1, 1, 0 }
  0x28   : > { %p68_p2 = scmp.eq.s32.totalorder %s67_s19, 0  ;;  %p1197_p3 = por %p137_p12, %p84_p11 }
  0x29   : > { %p1204_p4 = por %p161_p0, %p49_p5  ;;  %p167_p6 = scmp.eq.s32.totalorder %s746_s9, 2 }
  0x2a   : > { %s1431_s21 = scalar_select %p1197_p3, 1, 0 }
  0x2b   : > { %s1432_s22 = scalar_select %p1204_p4, 1, 0 }
  0x2c   : > { %s1209_s23 = scalar_select %p68_p2, %s1061_s28, %s70_s17  }
  0x2d   : > { %p1211_p7 = por %p167_p6, %p137_p12  ;;  %p748_p9 = scmp.ge.s32.totalorder %s1073_s7, 3 }
  0x2e   : > { %1433 = sst [smem:[#allocation21_spill]] %s1209_s23 }
  0x2f   : > { %s1434_s24 = scalar_select %p1211_p7, 1, 0 }
  0x30   : > { %209 = sbr.rel (%p748_p9) target bundleno = 122 (0x7a), region = 16 }
  0x31   : > { %1435 = sst [smem:[#allocation22_spill]] %s1434_s24 }
  0x37   : > { %212 = sbr.rel (!%p1177_p8) target bundleno = 67 (0x43), region = 20  ;;  %s214_s25 = sand.u32 (%p1177_p8), 1, %s1069_s30  }
  0x38   : > { %s750_s26 = sshll.u32 (%p1177_p8), %s1073_s7, 2  ;;  %s749_s11 = sshll.u32 (%p1177_p8), %s214_s25, 4 }
  0x39   : > { %s1436_s1 = sld [smem:[#allocation23_spill]] (%p1177_p8)  ;;  %s216_s14 = scalar_lea.vmem (%p1177_p8), [#allocation4], %s749_s11 }
  0x3f   : > { %s218_s9 = scalar_lea.vmem %s1436_s1, %s750_s26 }
  0x40   : > { %v234_v0 = vld [vmem:[%s218_s9] sm:$0xf]  ;;  %v236_v1 = vld [vmem:[%s218_s9 + $0xc] sm:$0xf]  ;;  %v238_v2 = vld [vmem:[%s218_s9 + $0x18] sm:$0xf] }
  0x41   : > { %235 = vst [vmem:[%s216_s14] sm:$0xf] %v234_v0  ;;  %237 = vst [vmem:[%s216_s14 + $0x4] sm:$0xf] %v236_v1  ;;  %v240_v3 = vld [vmem:[%s218_s9 + $0x24] sm:$0xf] }
  0x42   : > { %239 = vst [vmem:[%s216_s14 + $0x8] sm:$0xf] %v238_v2  ;;  %241 = vst [vmem:[%s216_s14 + $0xc] sm:$0xf] %v240_v3 }
  0x43 PF: > { %s1418_s17 = sand.u32 1, %s1061_s28   ;;  %s305_s11 = sand.u32 1, %s1069_s30  }
  0x44   : > { %s751_s19 = sshll.u32 %s1418_s17, 3  ;;  %s754_s14 = sshll.u32 %s305_s11, 3 }
  0x45   : > { %s787_s25 = scalar_select %p1188_p13, [#allocation3], [#allocation13] }
  0x46   : > { %s788_s26 = scalar_select %p1188_p13, %s1073_s7, 0 }
  0x47   : > { %s277_s13 = scalar_lea.vmem [#allocation5], %s751_s19  ;;  %s755_s1 = sshll.u32 %s1073_s7, 7 }
  0x48   : > { %s1232_s12 = sld [smem:[%s787_s25 + %s788_s26]]  ;;  %s285_s9 = sshll.u32 %s277_s13, 4  ;;  %s1240_s9 = int_to_ptr.vmem [resolvable:$true] %s285_s9 }
  0x49   : > { %s1238_s10 = scalar_lea.hbm %s1413_s4, %s755_s1  ;;  %s309_s17 = scalar_lea.vmem [#allocation8], %s754_s14 }
  0x4a   : > { %s316_s24 = sshll.u32 %s309_s17, 4  ;;  %s306_s25 = scalar_lea.sflag [#allocation9], %s305_s11  ;;  %s317_s24 = int_to_ptr.vmem [resolvable:$true] %s316_s24 }
  0x4b   : > { %s889_s26 = scalar_lea.hbm %s1238_s10, 128  ;;  %s893_s1 = scalar_lea.hbm %s1413_s4, 384 }
  0x4c   : > { %p890_p5 = scmp.ne.s32.totalorder %s1238_s10, %s889_s26  ;;  %p894_p12 = scmp.lt.u32.totalorder %s1238_s10, %s1413_s4 }
  0x4d   : > { %p895_p0 = scmp.lt.u32.totalorder %s893_s1, %s889_s26  ;;  %p897_p6 = scmp.lt.u32.totalorder %s889_s26, %s1238_s10 }
  0x4e   : > { %p891_p10 = pnand %p890_p5, %p1177_p8 }
  0x4f   : > { %p896_p2 = por %p895_p0, %p894_p12 }
  0x50   : > { %p892_p11 = pneg %p891_p10 }
  0x51   : > { %p898_p9 = por %p897_p6, %p896_p2 }
  0x53   : > { %p899_p7 = pnand %p898_p9, %p892_p11 }
  0x55   : > { %902 = shalt.err (!%p899_p7)
}
  0x56   : > { %s903_s17 = scalar_lea.vmem %s317_s24, 128  ;;  %s1076_s11 = smov [#allocation8]  }
  0x57   : > { %p904_p4 = scmp.ne.s32.totalorder %s317_s24, %s903_s17  ;;  %s907_s14 = sshll.u32 %s1076_s11, 4  ;;  %s908_s14 = int_to_ptr.vmem [resolvable:$false] %s907_s14 }
  0x58   : > { %s909_s19 = scalar_lea.vmem %s908_s14, 256  ;;  %p910_p3 = scmp.lt.s32.totalorder %s317_s24, %s908_s14 }
  0x59   : > { %p905_p5 = pnand %p904_p4, %p1177_p8  ;;  %p911_p1 = scmp.lt.s32.totalorder %s909_s19, %s903_s17 }
  0x5b   : > { %p906_p10 = pneg %p905_p5  ;;  %p912_p13 = por %p911_p1, %p910_p3 }
  0x5d   : > { %p913_p0 = pnand %p912_p13, %p906_p10 }
  0x5f   : > { %916 = shalt.err (!%p913_p0)
}
  0x60   : > { %790 = dma.hbm_to_vmem [thread:$0]  (%p1177_p8), %s1238_s10, 128, %s317_s24, %s306_s25  }
  0x61   : > { %s774_s26 = sshll.u32 %s1232_s12, 7  ;;  %s1437_s23 = sand.u32 1, %s1061_s28  }
  0x62   : > { %s1263_s15 = scalar_lea.hbm %s1411_s2, %s774_s26  ;;  %s1267_s17 = scalar_lea.sflag [#allocation6], %s1437_s23 }
  0x63   : > { %s917_s11 = scalar_lea.hbm %s1263_s15, 128  ;;  %p1438_p1 = scmp.ne.s32.totalorder %s1429_s18, 0 }
  0x64   : > { %p918_p13 = scmp.ne.s32.totalorder %s1263_s15, %s917_s11  ;;  %s921_s24 = scalar_lea.hbm %s1411_s2, 384 }
  0x65   : > { %p922_p8 = scmp.lt.u32.totalorder %s1263_s15, %s1411_s2  ;;  %p923_p7 = scmp.lt.u32.totalorder %s921_s24, %s917_s11 }
  0x66   : > { %p919_p3 = pnand %p918_p13, %p1438_p1  ;;  %p925_p12 = scmp.lt.u32.totalorder %s917_s11, %s1263_s15 }
  0x67   : > { %p924_p11 = por %p923_p7, %p922_p8 }
  0x68   : > { %p920_p4 = pneg %p919_p3 }
  0x69   : > { %p926_p2 = por %p925_p12, %p924_p11 }
  0x6b   : > { %p927_p6 = pnand %p926_p2, %p920_p4 }
  0x6d   : > { %930 = shalt.err (!%p927_p6)
}
  0x6e   : > { %s931_s14 = scalar_lea.vmem %s1240_s9, 128  ;;  %s1077_s19 = smov [#allocation5]  }
  0x6f   : > { %p932_p9 = scmp.ne.s32.totalorder %s1240_s9, %s931_s14  ;;  %s935_s26 = sshll.u32 %s1077_s19, 4  ;;  %s936_s26 = int_to_ptr.vmem [resolvable:$false] %s935_s26 }
  0x70   : > { %s937_s13 = scalar_lea.vmem %s936_s26, 256  ;;  %p938_p0 = scmp.lt.s32.totalorder %s1240_s9, %s936_s26 }
  0x71   : > { %p933_p5 = pnand %p932_p9, %p1438_p1  ;;  %p939_p13 = scmp.lt.s32.totalorder %s937_s13, %s931_s14 }
  0x73   : > { %p934_p10 = pneg %p933_p5  ;;  %p940_p3 = por %p939_p13, %p938_p0 }
  0x75   : > { %p941_p8 = pnand %p940_p3, %p934_p10 }
  0x77   : > { %944 = shalt.err (!%p941_p8)
}
  0x78   : > { %s1078_s1 = smov 64   ;;  %s1079_s23 = smov 4  }
  0x79   : > { %789 = dma.hbm_to_vmem [thread:$0]  (%p1438_p1), %s1263_s15, 128, %s1240_s9, %s1267_s17, %s1078_s1, %s1078_s1, %s1079_s23  }
  0x7a PF: > { %p756_p4 = scmp.ge.s32.totalorder %s1073_s7, 1  ;;  %p321_p7 = scmp.lt.s32.totalorder %s1073_s7, 4 }
  0x7c   : > { %p322_p11 = pnand %p756_p4, %p321_p7 }
  0x7d   : > { %s1294_s11 = sand.u32 (!%p322_p11), 1, %s1065_s29   ;;  %s334_s16 = sand.u32 (!%p322_p11), 1, %s1057_s27  }
  0x7e   : > { %325 = sbr.rel (%p322_p11) target bundleno = 430 (0x1ae), region = 73  ;;  %s757_s10 = sshll.u32 (!%p322_p11), %s1294_s11, 4 }
  0x7f   : > { %s758_s24 = sshll.u32 (!%p322_p11), %s334_s16, 3  ;;  %s330_s12 = scalar_lea.vmem (!%p322_p11), [#allocation4], %s757_s10 }
  0x80   : > { %s335_s25 = scalar_lea.sflag (!%p322_p11), [#allocation6], %s334_s16  ;;  %s338_s18 = scalar_lea.vmem (!%p322_p11), [#allocation5], %s758_s24 }
  0x81   : > { %p1439_p1 = scmp.ne.s32.totalorder (!%p322_p11), %s1430_s20, 0 }
  0x85   : > { %1032 = dma.done.wait (%p1439_p1), %s335_s25, 128  }
  0x86   : > { %1034 = vsyncadd (%p1439_p1), %s335_s25, 4294967168  ;;  %s759_s9 = sshll.u32 %s1294_s11, 3  ;;  %s344_s15 = scalar_lea.sflag [#allocation9], %s1294_s11 }
  0x87   : > { %s1306_s17 = scalar_lea.vmem [#allocation8], %s759_s9  ;;  %p1440_p12 = scmp.ne.s32.totalorder %s1431_s21, 0 }
  0x89   : > { %1036 = dma.done.wait (%p1440_p12), %s344_s15, 128  }
  0x8a   : > { %1038 = vsyncadd (%p1440_p12), %s344_s15, 4294967168  ;;  %v1080_v4 = vmov 0.0   ;;  %vm1081_vm0 = vmmov 0   ;;  %s395_s20 = sld [smem:[#allocation3 + %s1157_s8]]  ;;  %v1082_v5 = vmov 0   ;;  %v868_v6 = vld [vmem:[%s330_s12] sm:$0xff]  }
  0x8b   : > { %779 = vmatprep.subr.bf16.mxu0 %v1080_v4  ;;  %783 = vmatprep.mubr.msk.bf16.mxu0 %vm1081_vm0, %v1080_v4  ;;  %v869_v7 = vld [vmem:[%s330_s12 + $0x8] sm:$0xff]   ;;  %v870_v8 = vld [vmem:[%s338_s18] sm:$0x3f]   ;;  %vm438_vm1 = vcmask 261120   ;;  %vm544_vm2 = vcmask 1041408   ;;  %vm546_vm3 = vcmask 1043456  }
  0x8c   : > { %867 = vset.pattern.permute.xlu0 %v1082_v5  ;;  %780 = vmatpush3.bf16.msra.mxu0 %v868_v6  ;;  %v512_v20 = vld [vmem:[%s1306_s17 + $0x4] sm:$0xf]  ;;  %v483_v23 = vld [vmem:[%s1306_s17] sm:$0xf]  ;;  %s770_s13 = sshll.u32 %s1157_s8, 7  ;;  %s386_s1 = scalar_lea.vmem [#allocation10], %s759_s9 }
  0x8d   : > { %781 = vmatprep.subr.bf16.mxu0 %v1080_v4  ;;  %v513_v24 = vmul.f32 0.1, %v512_v20  ;;  %v484_v27 = vmul.f32 0.1, %v483_v23  ;;  %s578_s23 = sshll.u32 %s386_s1, 4  ;;  %vm548_vm4 = vcmask 1045504   ;;  %s1325_s12 = scalar_lea.hbm %s1414_s5, %s770_s13  ;;  %s1327_s23 = int_to_ptr.vmem [resolvable:$true] %s578_s23 }
  0x8e   : > { %s761_s16 = sshll.u32 %s1294_s11, 1  ;;  %s560_s25 = scalar_lea.sflag [#allocation7], %s1294_s11 }
  0x8f   : > { %v515_v28 = vrot.slane %v513_v24, 6  ;;  %v486_v30 = vrot.slane %v484_v27, 2  ;;  %s945_s18 = scalar_lea.vmem %s1327_s23, 128  ;;  %p1441_p9 = scmp.ne.s32.totalorder %s1432_s22, 0 }
  0x90   : > { %p396_p2 = scmp.lt.s32.totalorder %s395_s20, 2  ;;  %782 = vmatpush3.bf16.msra.mxu0 %v869_v7  ;;  %p946_p6 = scmp.ne.s32.totalorder %s1327_s23, %s945_s18 }
  0x91   : > { %s1083_s9 = smov [#allocation10]  }
  0x92   : > { %s1454_s20 = smov (!%p396_p2, %s395_s20), 2  ;;  %p947_p5 = pnand %p946_p6, %p1441_p9 }
  0x93   : > { %s775_s14 = sshll.u32 %s1454_s20, 4  ;;  %784 = vmatmul.mubr.msk.bf16.vlgmr.msra.gmra.mrb[0].mxu0 %vm438_vm1, %v870_v8  ;;  %s949_s15 = sshll.u32 %s1083_s9, 4  ;;  %s950_s15 = int_to_ptr.vmem [resolvable:$false] %s949_s15 }
  0x94   : > { %s400_s26 = scalar_lea.vmem %s1412_s3, %s775_s14  ;;  %p948_p10 = pneg %p947_p5 }
  0x95   : > { %v410_v9 = vld [vmem:[%s400_s26 + $0x8] sm:$0xf]  ;;  %v409_v10 = vld [vmem:[%s400_s26] sm:$0xff]  ;;  %s951_s17 = scalar_lea.vmem %s950_s15, 256  ;;  %p952_p0 = scmp.lt.s32.totalorder %s1327_s23, %s950_s15 }
  0x96   : > { %418 = vperm.xlu0 %867, %v410_v9   ;;  %p953_p13 = scmp.lt.s32.totalorder %s951_s17, %s945_s18 }
  0x98   : > { %p954_p3 = por %p953_p13, %p952_p0 }
  0x9a   : > { %413 = vperm.xlu0 %867, %v409_v10   ;;  %p955_p8 = pnand %p954_p3, %p948_p10 }
 0x115   : > { %v419_v11 = vpop.permute.xlu0 %418 }
 0x119   : > { %v414_v12 = vpop.permute.xlu0 %413 }
 0x166   : > { %v476_v13 = vpop.f32.mrb[0].mxu0 }
 0x167   : > { %v477_v14 = vadd.f32 %v476_v13, %v414_v12  ;;  %v785_v15 = vpop.f32.mrb[1].mxu0 }
 0x168   : > { %v479_v16 = vpop.f32.mrb[2].mxu0 }
 0x169   : > { %v490_v17 = vmul.f32 0.2, %v477_v14  ;;  %v480_v18 = vadd.f32 %v479_v16, %v419_v11  ;;  %v786_v19 = vpop.f32.mrb[3].mxu0  ;;  %v517_v31 = vmul.f32 %v515_v28, %v477_v14  ;;  %v488_v33 = vmul.f32 %v486_v30, %v477_v14 }
 0x16b   : > { %v491_v21 = vmul.f32 1.442695, %v490_v17  ;;  %v504_v22 = vrot.slane %v480_v18, 7  ;;  %v519_v36 = vrot.slane %v517_v31, 4  ;;  %v489_v39 = vadd.f32 %v488_v33, %v483_v23 }
 0x16d   : > { %871 = vpow2.f32 %v491_v21  ;;  %v506_v25 = vsub.f32 %v480_v18, %v504_v22  ;;  %v521_v43 = vadd.f32 %v519_v36, %v512_v20 }
 0x16f   : > { %v507_v26 = vsub.f32 0.0, %v506_v25 }
 0x171   : > { %v508_v29 = vmul.f32 1.442695, %v507_v26 }
 0x173   : > { %873 = vpow2.f32 %v508_v29 }
 0x177   : > { %v872_v32 = vpop.eup %871 }
 0x178   : > { %v493_v34 = vmul.f32 %v872_v32, %v483_v23  ;;  %v523_v35 = vrot.slane %v872_v32, 4 }
 0x17a   : > { %v494_v37 = vmul.f32 0.5, %v493_v34  ;;  %v525_v38 = vmul.f32 %v523_v35, %v512_v20  ;;  %v500_v45 = vrot.slane %v493_v34, 2 }
 0x17c   : > { %v496_v40 = vrot.slane %v494_v37, 2  ;;  %v526_v41 = vmul.f32 0.5, %v525_v38  ;;  %v532_v50 = vrot.slane %v525_v38, 2 }
 0x17d   : > { %v874_v42 = vpop.eup %873 }
 0x17e   : > { %v498_v44 = vsub.f32 %v489_v39, %v496_v40  ;;  %v528_v46 = vrot.slane %v526_v41, 2  ;;  %v510_v47 = vadd.f32 1.0, %v874_v42 }
 0x180   : > { %v502_v48 = vadd.f32 %v500_v45, %v498_v44  ;;  %v530_v49 = vsub.f32 %v521_v43, %v528_v46  ;;  %875 = vrcp.f32 %v510_v47 }
 0x182   : > { %v534_v51 = vadd.f32 %v532_v50, %v530_v49  ;;  %v536_v52 = vrot.slane %v502_v48, 6  ;;  %v539_v53 = vrot.slane %v530_v49, 4 }
 0x184   : > { %v542_v54 = vrot.slane %v534_v51, 2  ;;  %v545_v55 = vsel %vm544_vm2, %v498_v44, %v536_v52 }
 0x185   : > { %v547_v56 = vsel %vm546_vm3, %v545_v55, %v539_v53 }
 0x186   : > { %v549_v57 = vsel %vm548_vm4, %v547_v56, %v542_v54 }
 0x187   : > { %550 = vst [vmem:[%s386_s1] sm:$0xff] %v549_v57 }
 0x188   : > { %958 = shalt.err (!%p955_p8)
}
 0x189   : > { %s959_s20 = scalar_lea.hbm %s1325_s12, 128  ;;  %s963_s19 = scalar_lea.hbm %s1414_s5, 384 }
 0x18a   : > { %p960_p4 = scmp.ne.s32.totalorder %s1325_s12, %s959_s20  ;;  %p964_p1 = scmp.lt.u32.totalorder %s1325_s12, %s1414_s5 }
 0x18b   : > { %p965_p12 = scmp.lt.u32.totalorder %s963_s19, %s959_s20  ;;  %p967_p6 = scmp.lt.u32.totalorder %s959_s20, %s1325_s12 }
 0x18c   : > { %p961_p7 = pnand %p960_p4, %p1441_p9 }
 0x18d   : > { %p966_p2 = por %p965_p12, %p964_p1 }
 0x18e   : > { %p962_p11 = pneg %p961_p7 }
 0x18f   : > { %p968_p5 = por %p967_p6, %p966_p2 }
 0x191   : > { %p969_p10 = pnand %p968_p5, %p962_p11 }
 0x193   : > { %972 = shalt.err (!%p969_p10)
}
 0x194   : > { %793 = dma.vmem_to_hbm [thread:$0]  (%p1441_p9), %s1327_s23, 128, %s1325_s12, %s560_s25   ;;  %v876_v58 = vpop.eup %875  ;;  %vm556_vm5 = vcmask 1040384  }
 0x195   : > { %s771_s1 = sshll.u32 %s1157_s8, 5  ;;  %s393_s10 = scalar_lea.vmem [#allocation11], %s761_s16  ;;  %v552_v59 = vrot.slane %v876_v58, 1  ;;  %v554_v60 = vrot.slane %v876_v58, 2 }
 0x196   : > { %s591_s24 = sshll.u32 %s393_s10, 4  ;;  %s1357_s15 = scalar_lea.hbm %s1415_s6, %s771_s1  ;;  %s1359_s24 = int_to_ptr.vmem [resolvable:$true] %s591_s24 }
 0x197   : > { %v557_v61 = vsel %vm556_vm5, %v552_v59, %v554_v60  ;;  %s565_s8 = scalar_lea.sflag [#allocation12], %s1294_s11  ;;  %s973_s23 = scalar_lea.vmem %s1359_s24, 32 }
 0x198   : > { %558 = vst [vmem:[%s393_s10] sm:$0x3] %v557_v61  ;;  %p974_p0 = scmp.ne.s32.totalorder %s1359_s24, %s973_s23  ;;  %s1084_s16 = smov [#allocation11]  }
 0x199   : > { %s977_s12 = sshll.u32 %s1084_s16, 4  ;;  %s978_s12 = int_to_ptr.vmem [resolvable:$false] %s977_s12 }
 0x19a   : > { %p975_p13 = pnand %p974_p0, %p1441_p9  ;;  %s979_s25 = scalar_lea.vmem %s978_s12, 64 }
 0x19b   : > { %p980_p8 = scmp.lt.s32.totalorder %s1359_s24, %s978_s12  ;;  %p981_p4 = scmp.lt.s32.totalorder %s979_s25, %s973_s23 }
 0x19c   : > { %p976_p3 = pneg %p975_p13 }
 0x19d   : > { %p982_p7 = por %p981_p4, %p980_p8 }
 0x19f   : > { %p983_p11 = pnand %p982_p7, %p976_p3 }
 0x1a1   : > { %986 = shalt.err (!%p983_p11)
}
 0x1a2   : > { %s987_s11 = scalar_lea.hbm %s1357_s15, 32  ;;  %s991_s14 = scalar_lea.hbm %s1415_s6, 96 }
 0x1a3   : > { %p988_p1 = scmp.ne.s32.totalorder %s1357_s15, %s987_s11  ;;  %p992_p6 = scmp.lt.u32.totalorder %s1357_s15, %s1415_s6 }
 0x1a4   : > { %p993_p5 = scmp.lt.u32.totalorder %s991_s14, %s987_s11  ;;  %p995_p0 = scmp.lt.u32.totalorder %s987_s11, %s1357_s15 }
 0x1a5   : > { %p989_p12 = pnand %p988_p1, %p1441_p9 }
 0x1a6   : > { %p994_p10 = por %p993_p5, %p992_p6 }
 0x1a7   : > { %p990_p2 = pneg %p989_p12 }
 0x1a8   : > { %p996_p13 = por %p995_p0, %p994_p10 }
 0x1aa   : > { %p997_p3 = pnand %p996_p13, %p990_p2 }
 0x1ac   : > { %1000 = shalt.err (!%p997_p3)
}
 0x1ad   : > { %794 = dma.vmem_to_hbm [thread:$0]  (%p1441_p9), %s1359_s24, 32, %s1357_s15, %s565_s8  }
 0x1ae PF: > { %s1442_s26 = sld [smem:[#allocation22_spill]]  ;;  %p804_p8 = scmp.ge.s32.totalorder %s1073_s7, 2 }
 0x1af   : > { %s603_s13 = sand.u32 1, %s1049_s0  }
 0x1b0   : > { %s604_s1 = scalar_lea.sflag [#allocation7], %s603_s13 }
 0x1b4   : > { %p1443_p4 = scmp.ne.s32.totalorder %s1442_s26, 0 }
 0x1b6   : > { %p798_p7 = pnand %p804_p8, %p1443_p4 }
 0x1b8   : > { %1040 = dma.done.wait (!%p798_p7), %s604_s1, 128  }
 0x1b9   : > { %1042 = vsyncadd (!%p798_p7), %s604_s1, 4294967168  ;;  %s613_s10 = scalar_lea.sflag [#allocation12], %s603_s13 }
 0x1ba   : > { %1044 = dma.done.wait (!%p798_p7), %s613_s10, 32  }
 0x1bb   : > { %1046 = vsyncadd (!%p798_p7), %s613_s10, 4294967264  ;;  %s1444_s7 = sld [smem:[#allocation19_spill]]  ;;  %s1445_s22 = sld [smem:[#allocation21_spill]] }
 0x1bc   : > { %s1446_s24 = sld [smem:[#allocation20_spill]]  ;;  %s1447_s0 = smov %s1065_s29 }
 0x1bd   : > { %s1448_s26 = smov %s1057_s27  ;;  %s1449_s27 = smov %s1061_s28 }
 0x1be   : > { %s1451_s29 = smov %s1069_s30 }
 0x1c1   : > { %p32_p9 = scmp.ge.s32.totalorder %s1444_s7, 5   ;;  %s1450_s28 = smov %s1445_s22 }
 0x1c2   : > { %s1452_s30 = smov %s1446_s24 }
 0x1c3   :  { %34 = sbr.rel (!%p32_p9) target bundleno = 26 (0x1a), region = 163 }
 0x1ca   :  { %618 = vsyncpa [#allocation6], 1 }
 0x1cb   :  { %620 = vsyncpa [#allocation6 + $0x1], 1 }
 0x1cc   :  { %621 = vsyncpa [#allocation9], 1 }
 0x1cd   :  { %623 = vsyncpa [#allocation9 + $0x1], 1 }
 0x1ce   :  { %624 = vsyncpa [#allocation7], 1 }
 0x1cf   :  { %626 = vsyncpa [#allocation7 + $0x1], 1 }
 0x1d0   :  { %627 = vsyncpa [#allocation12], 1 }
 0x1d1   :  { %629 = vsyncpa [#allocation12 + $0x1], 1 }

</bundles_post_ra>
